<compile_context>
chip_gen: v7x
topology: tpu7x:2x2x1
jax: 0.10.0
libtpu: 0.0.40
codegen_flags: <defaults>
</compile_context>

<pallas_src>
import math

import jax
import jax.numpy as jnp
from jax.experimental import pallas as pl
from jax.experimental.pallas import tpu as pltpu


# ---------------------------------------------------------------------------
# Kernel
# ---------------------------------------------------------------------------
def _pos_enc_kernel(col_t_ref, row_t_ref, tile_ref, rep_ref, out_ref):
    # col_t_ref: (F, w)    transposed col table          (resident, same block)
    # row_t_ref: (F, th)   transposed row table, block i (th rows of this tile)
    # tile_ref:  (w, T)    one-hot: out[:, p] <- col_t[:, p % w]   (resident)
    # rep_ref:   (th, T)   one-hot: out[:, p] <- row_t[:, p // w]  (resident)
    # out_ref:   (2F, T)   lane-dense flat output block, T = th * w
    f = col_t_ref.shape[0]

    col_half = jnp.dot(col_t_ref[...], tile_ref[...],
                       precision=jax.lax.Precision.HIGHEST,
                       preferred_element_type=jnp.float32)
    row_half = jnp.dot(row_t_ref[...], rep_ref[...],
                       precision=jax.lax.Precision.HIGHEST,
                       preferred_element_type=jnp.float32)

    out_ref[:f, :] = col_half.astype(out_ref.dtype)
    out_ref[f:, :] = row_half.astype(out_ref.dtype)


# ---------------------------------------------------------------------------
# Tiling helpers
# ---------------------------------------------------------------------------
def _vmem_capacity_bytes():
    """Physical VMEM bytes of the current chip (generation-aware tiling)."""
    try:
        info = pltpu.get_tpu_info()
        for name in ("vmem_capacity_bytes", "vmem_bytes", "vmem_capacity"):
            v = getattr(info, name, None)
            if v:
                return int(v)
    except Exception:  # noqa: BLE001 - fall back to the common 128 MiB chips
        pass
    return 128 << 20


def _choose_block_rows(h, w, two_f, num_feats, itemsize, max_block_bytes,
                       prefer_split):
    """Rows per output block.

    Returns either h (single block; every block dim == full array dim, always
    legal) or a multiple of 128, so that the flattened output block's lane dim
    th*w is a multiple of 128 and the (F, th) row-table block satisfies the
    lane-tiling constraint.  128-row granularity also subsumes the sublane
    packing (8/16/32) of every dtype.  The cost model includes the one-hot
    expansion matrices (rep grows as th^2 * w).
    """
    base = 128

    def block_bytes(rows):
        t = rows * w
        return itemsize * (two_f * t + rows * t + w * t + num_feats * (rows + w))

    want_split = prefer_split and h >= 2 * base   # v7x: feed both TensorCores
    if block_bytes(h) <= max_block_bytes and not want_split:
        return h
    if h <= base:
        return h                                  # cannot tile legally below 128
    th = (h // base) * base
    if want_split:
        th = min(th, max(base, (((h + 1) // 2) // base) * base))
    while th > base and block_bytes(th) > max_block_bytes:
        th -= base
    return max(base, min(th, h))


# ---------------------------------------------------------------------------
# Wrapper
# ---------------------------------------------------------------------------
def learned_positional_encoding(mask, row_embed, col_embed, *,
                                max_block_bytes=None,
                                min_pallas_bytes=64 << 10):
    """Pallas implementation of LearnedPositionalEncoding.forward.

    Args:
      mask: [bs, h, w] array (values unused; only the shape matters, as in torch).
      row_embed: [row_num_embed, num_feats] embedding table.
      col_embed: [col_num_embed, num_feats] embedding table.
      max_block_bytes: optional override of the per-block VMEM budget (testing).
      min_pallas_bytes: below this output size the pure-JAX path is used.

    Returns:
      pos: [bs, 2*num_feats, h, w] in the embeddings' dtype.
    """
    bs, h, w = mask.shape
    num_feats = row_embed.shape[1]
    assert col_embed.shape[1] == num_feats, "row/col feature dims differ"
    assert h <= row_embed.shape[0], "h exceeds row_num_embed"
    assert w <= col_embed.shape[0], "w exceeds col_num_embed"

    out_dtype = jnp.result_type(row_embed.dtype, col_embed.dtype)
    itemsize = jnp.dtype(out_dtype).itemsize
    two_f = 2 * num_feats
    out_bytes = two_f * h * w * itemsize

    # Tiny outputs (pallas_call fixed overhead dominates), non-8-multiple
    # feature dims, or degenerate spatial sizes: pure-JAX fallback.
    if out_bytes < min_pallas_bytes or num_feats % 8 != 0 or h * w < 128:
        return _reference(mask, row_embed, col_embed)

    vmem_cap = _vmem_capacity_bytes()
    small_vmem = vmem_cap <= (80 << 20)            # v7x-class (64 MiB physical)
    if max_block_bytes is None:
        max_block_bytes = (5 << 20) if small_vmem else (16 << 20)

    th = _choose_block_rows(h, w, two_f, num_feats, itemsize,
                            max_block_bytes, prefer_split=small_vmem)
    grid_h = pl.cdiv(h, th)
    t_flat = th * w                                # lane dim of the out block

    # Tiny wrapper-side table prep (a few KiB of XLA work):
    #   * embedding "lookup" with arange indices == first h / w table rows,
    #   * pre-transpose both tables so the kernel needs no in-kernel transpose,
    #   * zero-pad the row table to a whole number of blocks so the clipped
    #     last block never feeds garbage (NaN/Inf) into the matmul.
    col_t = col_embed[:w].astype(out_dtype).T                  # (F, w)
    row_t = row_embed[:h].astype(out_dtype).T                  # (F, h)
    h_pad = grid_h * th
    if h_pad != h:
        row_t = jnp.pad(row_t, ((0, 0), (0, h_pad - h)))       # (F, h_pad)

    # One-hot expansion matrices (0.0 / 1.0 are exact in every float dtype).
    p = jnp.arange(t_flat, dtype=jnp.int32)
    tile_mat = (p[None, :] % w ==
                jnp.arange(w, dtype=jnp.int32)[:, None]).astype(out_dtype)   # (w, T)
    rep_mat = (p[None, :] // w ==
               jnp.arange(th, dtype=jnp.int32)[:, None]).astype(out_dtype)   # (th, T)

    # Explicit VMEM budget: everything double-buffered + headroom.
    per_block = itemsize * (two_f * t_flat + th * t_flat + w * t_flat
                            + num_feats * (th + w))
    vmem_limit = int(min(max(16 << 20, 2 * per_block + (4 << 20)), 128 << 20))

    pos_flat = pl.pallas_call(
        _pos_enc_kernel,
        out_shape=jax.ShapeDtypeStruct((two_f, h * w), out_dtype),
        grid=(grid_h,),
        in_specs=[
            pl.BlockSpec((num_feats, w), lambda i: (0, 0)),     # col_t, resident
            pl.BlockSpec((num_feats, th), lambda i: (0, i)),    # row_t block i
            pl.BlockSpec((w, t_flat), lambda i: (0, 0)),        # tile_mat, resident
            pl.BlockSpec((th, t_flat), lambda i: (0, 0)),       # rep_mat, resident
        ],
        out_specs=pl.BlockSpec((two_f, t_flat), lambda i: (0, i)),
        compiler_params=pltpu.CompilerParams(
            dimension_semantics=("parallel",),
            vmem_limit_bytes=vmem_limit,
        ),
    )(col_t, row_t, tile_mat, rep_mat)

    pos = pos_flat.reshape(two_f, h, w)            # free: trailing dims contiguous
    # The encoding is identical for every batch element (mask values are never
    # read); this broadcast is normally fused into the consumer by XLA rather
    # than materialized bs times in HBM.
    return jnp.broadcast_to(pos[None], (bs, two_f, h, w))


# ---------------------------------------------------------------------------
# Pure-JAX reference (mirrors the PyTorch forward exactly); also the fallback.
# ---------------------------------------------------------------------------
def _reference(mask, row_embed, col_embed):
    bs, h, w = mask.shape
    out_dtype = jnp.result_type(row_embed.dtype, col_embed.dtype)
    x_embed = col_embed[:w].astype(out_dtype)                   # (w, F)
    y_embed = row_embed[:h].astype(out_dtype)                   # (h, F)
    pos = jnp.concatenate(
        [
            jnp.broadcast_to(x_embed[None, :, :], (h, w, x_embed.shape[-1])),
            jnp.broadcast_to(y_embed[:, None, :], (h, w, y_embed.shape[-1])),
        ],
        axis=-1,
    )                                                           # (h, w, 2F)
    pos = jnp.transpose(pos, (2, 0, 1))                         # (2F, h, w)
    return jnp.broadcast_to(pos[None], (bs,) + pos.shape)


# ---------------------------------------------------------------------------
# Self-test
# ---------------------------------------------------------------------------
if __name__ == "__main__":
    root_key = jax.random.PRNGKey(0)

    def check(idx, bs, num_feats, h, w, **kw):
        key = jax.random.fold_in(root_key, idx)
        k_row, k_col, k_mask = jax.random.split(key, 3)
        row_num_embed = max(50, h)
        col_num_embed = max(50, w)
        # nn.Embedding default init: N(0, 1).
        row_embed = jax.random.normal(k_row, (row_num_embed, num_feats), jnp.float32)
        col_embed = jax.random.normal(k_col, (col_num_embed, num_feats), jnp.float32)
        # ByteTensor-style mask; values are irrelevant to the output.
        mask = (jax.random.uniform(k_mask, (bs, h, w)) > 0.5).astype(jnp.uint8)

        pos = learned_positional_encoding(mask, row_embed, col_embed, **kw)
        pos = jax.block_until_ready(pos)
        ref = _reference(mask, row_embed, col_embed)

        assert pos.shape == (bs, 2 * num_feats, h, w), pos.shape
        assert jnp.allclose(pos, ref, rtol=1e-4, atol=1e-4), f"mismatch in case {idx}"

    # 1) Main Pallas path (single lane-dense block).
    check(0, bs=2, num_feats=16, h=24, w=24)
    # 2) Forced multi-block path: 128-row tiles, partial (clipped) final block.
    check(1, bs=2, num_feats=16, h=200, w=32, max_block_bytes=600 << 10)
    # 3) Tiny / non-multiple-of-8 feature dim -> pure-JAX fallback path.
    check(2, bs=2, num_feats=12, h=7, w=9)

    print("KERNEL_OK")
</pallas_src>

<mosaic_0001>
module attributes {stable_mosaic.version = 11 : i64} {
  func.func @_pos_enc_kernel(%arg0: i32, %arg1: memref<16x24xf32, #tpu.memory_space<vmem>>, %arg2: memref<16x24xf32, #tpu.memory_space<vmem>>, %arg3: memref<24x576xf32, #tpu.memory_space<vmem>>, %arg4: memref<24x576xf32, #tpu.memory_space<vmem>>, %arg5: memref<32x576xf32, #tpu.memory_space<vmem>>) attributes {dimension_semantics = [#tpu.dimension_semantics<parallel>], iteration_bounds = array<i64: 1>, scalar_prefetch = 0 : i64, scratch_operands = 0 : i64, tpu.core_type = #tpu.core_type<tc>, window_params = [{pipeline_mode = #tpu.pipeline_mode<synchronous>, transform_indices = @transform_0, window_bounds = array<i64: 16, 24>}, {transform_indices = @transform_1, window_bounds = array<i64: 16, 24>}, {pipeline_mode = #tpu.pipeline_mode<synchronous>, transform_indices = @transform_2, window_bounds = array<i64: 24, 576>}, {pipeline_mode = #tpu.pipeline_mode<synchronous>, transform_indices = @transform_3, window_bounds = array<i64: 24, 576>}, {transform_indices = @transform_4, window_bounds = array<i64: 32, 576>}]} {
    %c0 = arith.constant 0 : index
    %c0_0 = arith.constant 0 : index
    %0 = vector.load %arg1[%c0, %c0_0] : memref<16x24xf32, #tpu.memory_space<vmem>>, vector<16x24xf32>
    %c0_1 = arith.constant 0 : index
    %c0_2 = arith.constant 0 : index
    %1 = vector.load %arg3[%c0_1, %c0_2] : memref<24x576xf32, #tpu.memory_space<vmem>>, vector<24x576xf32>
    %cst = arith.constant dense<0.000000e+00> : vector<16x576xf32>
    %2 = tpu.matmul %0, %1, %cst {dimension_numbers = #tpu.dot_dimension_numbers<[1], [0], [0], [1], [0, 0, 1, 1], [], []>, precision = #tpu.contract_precision<fp32>} : vector<16x24xf32>, vector<24x576xf32>, vector<16x576xf32> -> vector<16x576xf32>
    %c0_3 = arith.constant 0 : index
    %c0_4 = arith.constant 0 : index
    %3 = vector.load %arg2[%c0_3, %c0_4] : memref<16x24xf32, #tpu.memory_space<vmem>>, vector<16x24xf32>
    %c0_5 = arith.constant 0 : index
    %c0_6 = arith.constant 0 : index
    %4 = vector.load %arg4[%c0_5, %c0_6] : memref<24x576xf32, #tpu.memory_space<vmem>>, vector<24x576xf32>
    %cst_7 = arith.constant dense<0.000000e+00> : vector<16x576xf32>
    %5 = tpu.matmul %3, %4, %cst_7 {dimension_numbers = #tpu.dot_dimension_numbers<[1], [0], [0], [1], [0, 0, 1, 1], [], []>, precision = #tpu.contract_precision<fp32>} : vector<16x24xf32>, vector<24x576xf32>, vector<16x576xf32> -> vector<16x576xf32>
    %c0_8 = arith.constant 0 : index
    %c0_9 = arith.constant 0 : index
    %6 = vector.load %arg5[%c0_8, %c0_9] : memref<32x576xf32, #tpu.memory_space<vmem>>, vector<16x576xf32>
    tpu.vector_store %arg5[%c0_8, %c0_9], %2 {strides = array<i32>} : memref<32x576xf32, #tpu.memory_space<vmem>>, vector<16x576xf32>,
    %c16 = arith.constant 16 : index
    %c0_10 = arith.constant 0 : index
    %7 = vector.load %arg5[%c16, %c0_10] : memref<32x576xf32, #tpu.memory_space<vmem>>, vector<16x576xf32>
    tpu.vector_store %arg5[%c16, %c0_10], %5 {strides = array<i32>} : memref<32x576xf32, #tpu.memory_space<vmem>>, vector<16x576xf32>,
    return
  }
  func.func @transform_0(%arg0: i32) -> (i32, i32) {
    %c0_i32 = arith.constant 0 : i32
    %c0_i32_0 = arith.constant 0 : i32
    %c0_i32_1 = arith.constant 0 : i32
    return %c0_i32, %c0_i32_0 : i32, i32
  }
  func.func @transform_1(%arg0: i32) -> (i32, i32) {
    %c0_i32 = arith.constant 0 : i32
    %c0_i32_0 = arith.constant 0 : i32
    return %c0_i32, %arg0 : i32, i32
  }
  func.func @transform_2(%arg0: i32) -> (i32, i32) {
    %c0_i32 = arith.constant 0 : i32
    %c0_i32_0 = arith.constant 0 : i32
    %c0_i32_1 = arith.constant 0 : i32
    return %c0_i32, %c0_i32_0 : i32, i32
  }
  func.func @transform_3(%arg0: i32) -> (i32, i32) {
    %c0_i32 = arith.constant 0 : i32
    %c0_i32_0 = arith.constant 0 : i32
    %c0_i32_1 = arith.constant 0 : i32
    return %c0_i32, %c0_i32_0 : i32, i32
  }
  func.func @transform_4(%arg0: i32) -> (i32, i32) {
    %c0_i32 = arith.constant 0 : i32
    %c0_i32_0 = arith.constant 0 : i32
    return %c0_i32, %arg0 : i32, i32
  }
}

</mosaic_0001>

<bundles_post_ra>
// kernel: tpu_custom_call.1
= control target key start
LH: loop header
LB: loop body
LE: loop exit
PB: predicated region body
PF: predicated region fallthrough
CT: control target
= control target key end

     0   :  { %9 = vsyncpa [#allocation3], 0  ;;  %s4709_s0 = inlined_call_operand.hbm [shape: f32[16,24], index: 0, kind: input, shape index: {}]   ;;  %s4710_s1 = inlined_call_operand.hbm [shape: f32[16,24], index: 1, kind: input, shape index: {}]   ;;  %s4711_s2 = inlined_call_operand.hbm [shape: f32[24,576], index: 2, kind: input, shape index: {}]   ;;  %s4712_s3 = inlined_call_operand.hbm [shape: f32[24,576], index: 3, kind: input, shape index: {}]   ;;  %s4713_s4 = inlined_call_operand.hbm [shape: f32[32,576], index: 4, kind: output, shape index: {}]  }
   0x1   :  { %10 = vsyncpa [#allocation6], 0 }
   0x2   :  { %11 = vsyncpa [#allocation9], 0 }
   0x3   :  { %12 = vsyncpa [#allocation4], 0  ;;  %s3994_s15 = smov [#allocation5]   ;;  %s3995_s17 = smov [#allocation2]  }
   0x4   :  { %s30_s16 = sshll.u32 %s3994_s15, 4  ;;  %s18_s18 = sshll.u32 %s3995_s17, 4  ;;  %s31_s16 = int_to_ptr.vmem [resolvable:$true] %s30_s16  ;;  %s4029_s18 = int_to_ptr.vmem [resolvable:$true] %s18_s18 }
   0x5   :  { %s3876_s21 = scalar_lea.hbm %s4710_s1, 256 }
   0x6   :  { %p3877_p0 = scmp.ne.s32.totalorder %s4710_s1, %s3876_s21  ;;  %p3880_p1 = scmp.lt.u32.totalorder %s3876_s21, %s4710_s1 }
   0x8   :  { %p3882_p2 = pnand %p3880_p1, %p3877_p0 }
   0xa   :  { %3885 = shalt.err (!%p3882_p2)
}
   0xb   :  { %s3886_s26 = scalar_lea.vmem %s31_s16, 256  ;;  %p3891_p4 = scmp.lt.s32.totalorder %s31_s16, %s31_s16 }
   0xc   :  { %p3887_p3 = scmp.ne.s32.totalorder %s31_s16, %s3886_s26  ;;  %p3892_p5 = scmp.lt.s32.totalorder %s3886_s26, %s3886_s26 }
   0xe   :  { %p3893_p6 = por %p3892_p5, %p3891_p4 }
  0x10   :  { %p3894_p7 = pnand %p3893_p6, %p3887_p3 }
  0x12   :  { %3897 = shalt.err (!%p3894_p7)
}
  0x13   :  { %s3996_s27 = smov 128   ;;  %s3997_s28 = smov 8  }
  0x14   :  { %36 = dma.hbm_to_vmem [thread:$0]  %s4710_s1, 256, %s31_s16, [#allocation6], %s3996_s27, %s3996_s27, %s3997_s28  }
  0x15   :  { %s3898_s7 = scalar_lea.hbm %s4709_s0, 256 }
  0x16   :  { %p3899_p8 = scmp.ne.s32.totalorder %s4709_s0, %s3898_s7  ;;  %p3902_p9 = scmp.lt.u32.totalorder %s3898_s7, %s4709_s0 }
  0x18   :  { %p3904_p10 = pnand %p3902_p9, %p3899_p8 }
  0x1a   :  { %3907 = shalt.err (!%p3904_p10)
}
  0x1b   :  { %s3908_s12 = scalar_lea.vmem %s4029_s18, 256  ;;  %p3913_p12 = scmp.lt.s32.totalorder %s4029_s18, %s4029_s18 }
  0x1c   :  { %p3909_p11 = scmp.ne.s32.totalorder %s4029_s18, %s3908_s12  ;;  %p3914_p13 = scmp.lt.s32.totalorder %s3908_s12, %s3908_s12 }
  0x1e   :  { %p3915_p0 = por %p3914_p13, %p3913_p12 }
  0x20   :  { %p3916_p1 = pnand %p3915_p0, %p3909_p11 }
  0x22   :  { %3919 = shalt.err (!%p3916_p1)
}
  0x23   :  { %24 = dma.hbm_to_vmem [thread:$0]  %s4709_s0, 256, %s4029_s18, [#allocation3], %s3996_s27, %s3996_s27, %s3997_s28  }
  0x24   :  { %s3998_s14 = smov [#allocation7]   ;;  %s3920_s19 = scalar_lea.hbm %s4711_s2, 1920 }
  0x25   :  { %s42_s15 = sshll.u32 %s3998_s14, 4  ;;  %p3921_p2 = scmp.ne.s32.totalorder %s4711_s2, %s3920_s19  ;;  %s43_s15 = int_to_ptr.vmem [resolvable:$true] %s42_s15 }
  0x26   :  { %p3924_p3 = scmp.lt.u32.totalorder %s3920_s19, %s4711_s2 }
  0x28   :  { %p3926_p4 = pnand %p3924_p3, %p3921_p2 }
  0x2a   :  { %3929 = shalt.err (!%p3926_p4)
}
  0x2b   :  { %s3930_s24 = scalar_lea.vmem %s43_s15, 1920  ;;  %p3935_p6 = scmp.lt.s32.totalorder %s43_s15, %s43_s15 }
  0x2c   :  { %p3931_p5 = scmp.ne.s32.totalorder %s43_s15, %s3930_s24  ;;  %p3936_p7 = scmp.lt.s32.totalorder %s3930_s24, %s3930_s24 }
  0x2e   :  { %p3937_p8 = por %p3936_p7, %p3935_p6 }
  0x30   :  { %p3938_p9 = pnand %p3937_p8, %p3931_p5 }
  0x32   :  { %3941 = shalt.err (!%p3938_p9)
}
  0x33   :  { %s3999_s0 = smov 640   ;;  %s4000_s18 = smov 40  }
  0x34   :  { %48 = dma.hbm_to_vmem [thread:$0]  %s4711_s2, 1920, %s43_s15, [#allocation6], %s3999_s0, %s3999_s0, %s4000_s18  }
  0x35   :  { %s4001_s27 = smov [#allocation8]   ;;  %s3942_s5 = scalar_lea.hbm %s4712_s3, 1920 }
  0x36   :  { %s54_s28 = sshll.u32 %s4001_s27, 4  ;;  %p3943_p10 = scmp.ne.s32.totalorder %s4712_s3, %s3942_s5  ;;  %s55_s28 = int_to_ptr.vmem [resolvable:$true] %s54_s28 }
  0x37   :  { %p3946_p11 = scmp.lt.u32.totalorder %s3942_s5, %s4712_s3 }
  0x39   :  { %p3948_p12 = pnand %p3946_p11, %p3943_p10 }
  0x3b   :  { %3951 = shalt.err (!%p3948_p12)
}
  0x3c   :  { %s3952_s10 = scalar_lea.vmem %s55_s28, 1920  ;;  %p3957_p0 = scmp.lt.s32.totalorder %s55_s28, %s55_s28 }
  0x3d   :  { %p3953_p13 = scmp.ne.s32.totalorder %s55_s28, %s3952_s10  ;;  %p3958_p1 = scmp.lt.s32.totalorder %s3952_s10, %s3952_s10 }
  0x3f   :  { %p3959_p2 = por %p3958_p1, %p3957_p0 }
  0x41   :  { %p3960_p3 = pnand %p3959_p2, %p3953_p13 }
  0x43   :  { %3963 = shalt.err (!%p3960_p3)
}
  0x44   :  { %60 = dma.hbm_to_vmem [thread:$0]  %s4712_s3, 1920, %s55_s28, [#allocation9], %s3999_s0, %s3999_s0, %s4000_s18  }
  0x45   :  { %3986 = dma.done.wait [#allocation3], 256  }
  0x46   :  { %3987 = vsyncadd [#allocation3], 4294967040 }
  0x47   :  { %3988 = dma.done.wait [#allocation6], 2176  }
  0x48   :  { %3989 = vsyncadd [#allocation6], 4294965120 }
  0x49   :  { %3990 = dma.done.wait [#allocation9], 1920  }
  0x4a   :  { %3991 = vsyncadd [#allocation9], 4294965376  ;;  %v4002_v0 = vmov 0.0   ;;  %v76_v1 = vld [vmem:[#allocation7 + $0x8] sm:$0xff]  ;;  %v81_v2 = vld [vmem:[#allocation7 + $0x30] sm:$0xff]  ;;  %vm90_vm0 = vcmask 195584  }
  0x4b   :  { %167 = vmatprep.mubr.f32.mxu0 %v4002_v0  ;;  %733 = vmatprep.mubr.f32.mxu1 %v4002_v0  ;;  %v78_v3 = vld [vmem:[#allocation7 + $0x18] sm:$0xff]  ;;  %v97_v4 = vand.u32 4294901760, %v76_v1  ;;  %v101_v5 = vand.u32 4294901760, %v81_v2  ;;  %v83_v6 = vld [vmem:[#allocation7 + $0x40] sm:$0xff]  ;;  %v80_v9 = vld [vmem:[#allocation7 + $0x28] sm:$0xff]  ;;  %vm3418_vm1 = vcmask 523264  }
  0x4c   :  { %v663_v7 = vand.u32 4294901760, %v78_v3  ;;  %v75_v8 = vld [vmem:[#allocation7] sm:$0xff]  ;;  %v667_v10 = vand.u32 4294901760, %v83_v6  ;;  %v103_v12 = vand.u32 4294901760, %v80_v9  ;;  %v77_v13 = vld [vmem:[#allocation7 + $0x10] sm:$0xff]  ;;  %v82_v14 = vld [vmem:[#allocation7 + $0x38] sm:$0xff] }
  0x4d   :  { %v99_v11 = vand.u32 4294901760, %v75_v8  ;;  %v4092_v15 = vld [vmem:[#allocation7 + $0x58] sm:$0xff]  ;;  %v4094_v16 = vpack.c.bf16 %v101_v5, %v97_v4  ;;  %v4096_v17 = vsub.f32 %v76_v1, %v97_v4  ;;  %v4098_v18 = vsub.f32 %v81_v2, %v101_v5  ;;  %v4102_v20 = vld [vmem:[#allocation7 + $0x68] sm:$0xff]  ;;  %v85_v21 = vld [vmem:[#allocation7 + $0x50] sm:$0xff]  ;;  %s4003_s3 = smov [#allocation10]  }
  0x4e   :  { %v4100_v19 = vsub.f32 %v78_v3, %v663_v7  ;;  %v87_v22 = vld [vmem:[#allocation7 + $0x60] sm:$0xff]  ;;  %v4104_v23 = vpack.c.bf16 %v667_v10, %v663_v7  ;;  %v4106_v24 = vsub.f32 %v83_v6, %v667_v10  ;;  %v4113_v28 = vsub.f32 %v80_v9, %v103_v12  ;;  %v74_v60 = vld [vmem:[#allocation2 + $0x8] sm:$0xff]  ;;  %s3440_s12 = sshll.u32 %s4003_s3, 4  ;;  %s3441_s12 = int_to_ptr.vmem [resolvable:$true] %s3440_s12 }
  0x4f   :  { %v4108_v25 = vpack.c.bf16 %v103_v12, %v99_v11  ;;  %v4110_v26 = vsub.f32 %v75_v8, %v99_v11  ;;  %v73_v27 = vld [vmem:[#allocation2] sm:$0xff]  ;;  %3623 = vmatprep.subr.bf16.mxu0 %v4094_v16  ;;  %v665_v29 = vand.u32 4294901760, %v77_v13  ;;  %v669_v30 = vand.u32 4294901760, %v82_v14  ;;  %s3964_s1 = scalar_lea.vmem %s3441_s12, 2560  ;;  %p3969_p5 = scmp.lt.s32.totalorder %s3441_s12, %s3441_s12 }
  0x50   :  { %v4116_v31 = vand.u32 4294901760, %v4092_v15  ;;  %3647 = vmatprep.subr.bf16.mxu1 %v4104_v23  ;;  %v4121_v32 = vand.u32 4294901760, %v4102_v20  ;;  %v4123_v33 = vand.u32 4294901760, %v85_v21  ;;  %v4125_v34 = vand.u32 4294901760, %v87_v22  ;;  %p3965_p4 = scmp.ne.s32.totalorder %s3441_s12, %s3964_s1  ;;  %p3970_p6 = scmp.lt.s32.totalorder %s3964_s1, %s3964_s1 }
  0x51   :  { %3625 = vmatpush1.bf16.msra.mxu0 %v4108_v25  ;;  %v92_v35 = vsel %vm90_vm0, %v73_v27, 0  ;;  %v4128_v36 = vpack.c.bf16 %v669_v30, %v665_v29  ;;  %v4130_v37 = vsub.f32 %v77_v13, %v665_v29  ;;  %v4132_v38 = vsub.f32 %v82_v14, %v669_v30 }
  0x52   :  { %106 = vmatprep.subr.mxu0 %v4116_v31  ;;  %v4135_v39 = vand.u32 4294901760, %v92_v35  ;;  %v4138_v40 = vsub.f32 %v85_v21, %v4123_v33  ;;  %v4141_v41 = vsub.f32 %v87_v22, %v4125_v34  ;;  %v192_v42 = vand.u32 4294901760, %v4096_v17  ;;  %p3971_p7 = por %p3970_p6, %p3969_p5 }
  0x53   :  { %v204_v43 = vand.u32 4294901760, %v4098_v18  ;;  %3649 = vmatpush1.bf16.msra.mxu1 %v4128_v36  ;;  %v198_v45 = vand.u32 4294901760, %v4110_v26  ;;  %v210_v46 = vand.u32 4294901760, %v4113_v28  ;;  %v758_v47 = vand.u32 4294901760, %v4100_v19 }
  0x54   :  { %v4147_v44 = vsub.f32 %v92_v35, %v4135_v39  ;;  %672 = vmatprep.subr.mxu1 %v4121_v32  ;;  %v193_v48 = vsub.f32 %v4096_v17, %v192_v42  ;;  %v770_v50 = vand.u32 4294901760, %v4106_v24  ;;  %v764_v51 = vand.u32 4294901760, %v4130_v37  ;;  %p3972_p8 = pnand %p3971_p7, %p3965_p4 }
  0x55   :  { %108 = vmatpush1.msra.mxu0 %v4123_v33  ;;  %v205_v49 = vsub.f32 %v4098_v18, %v204_v43  ;;  %v199_v53 = vsub.f32 %v4110_v26, %v198_v45  ;;  %v211_v54 = vsub.f32 %v4113_v28, %v210_v46  ;;  %v759_v55 = vsub.f32 %v4100_v19, %v758_v47 }
  0x56   :  { %v4163_v52 = vand.u32 4294901760, %v4147_v44  ;;  %v194_v56 = vand.u32 4294901760, %v193_v48  ;;  %v771_v58 = vsub.f32 %v4106_v24, %v770_v50  ;;  %v765_v59 = vsub.f32 %v4130_v37, %v764_v51 }
  0x57   :  { %v206_v57 = vand.u32 4294901760, %v205_v49  ;;  %674 = vmatpush1.msra.mxu1 %v4125_v34  ;;  %v200_v62 = vand.u32 4294901760, %v199_v53  ;;  %v212_v63 = vand.u32 4294901760, %v211_v54  ;;  %v760_v1 = vand.u32 4294901760, %v759_v55 }
  0x58   :  { %v171_v61 = vsub.f32 %v4147_v44, %v4163_v52  ;;  %v772_v3 = vand.u32 4294901760, %v771_v58  ;;  %v766_v4 = vand.u32 4294901760, %v765_v59  ;;  %v776_v5 = vand.u32 4294901760, %v4132_v38 }
  0x59   :  { %v3626_v2 = vpack.c.bf16 %v206_v57, %v194_v56  ;;  %v3628_v7 = vpack.c.bf16 %v212_v63, %v200_v62  ;;  %v95_v8 = vsel %vm90_vm0, %v74_v60, 0  ;;  %v4189_v9 = vsub.f32 %v4092_v15, %v4116_v31 }
  0x5a   :  { %v4184_v6 = vand.u32 4294901760, %v171_v61  ;;  %v3650_v10 = vpack.c.bf16 %v772_v3, %v760_v1  ;;  %v777_v11 = vsub.f32 %v4132_v38, %v776_v5  ;;  %v4194_v12 = vand.u32 4294901760, %v95_v8  ;;  %v4272_v3 = vld [vmem:[#allocation7 + $0x20] sm:$0xff] }
  0x5b   :  { %3627 = vmatprep.subr.bf16.mxu0 %v3626_v2  ;;  %v222_v13 = vand.u32 4294901760, %v4138_v40  ;;  %v216_v14 = vand.u32 4294901760, %v4189_v9  ;;  %v4202_v15 = vsub.f32 %v4102_v20, %v4121_v32  ;;  %v788_v21 = vand.u32 4294901760, %v4141_v41 }
  0x5c   :  { %173 = vmatmul.mubr.f32.vlgmr.msra.gmra.mrb[0].mxu0 %v4184_v6  ;;  %739 = vmatmul.mubr.f32.vlgmr.msra.gmra.mrb[0].mxu1 %v4184_v6  ;;  %v778_v22 = vand.u32 4294901760, %v777_v11  ;;  %v4206_v27 = vsub.f32 %v95_v8, %v4194_v12  ;;  %v3630_v56 = vpack.c.bf16 %v4098_v18, %v4096_v17  ;;  %v3654_v61 = vpack.c.bf16 %v4106_v24, %v4100_v19  ;;  %v1752_v8 = vld [vmem:[#allocation8 + $0x30] sm:$0xff] }
  0x5d   :  { %3629 = vmatpush1.bf16.msra.mxu0 %v3628_v7  ;;  %3651 = vmatprep.subr.bf16.mxu1 %v3650_v10  ;;  %v223_v29 = vsub.f32 %v4138_v40, %v222_v13  ;;  %v217_v20 = vsub.f32 %v4189_v9, %v216_v14  ;;  %v782_v30 = vand.u32 4294901760, %v4202_v15  ;;  %v789_v35 = vsub.f32 %v4141_v41, %v788_v21  ;;  %v84_v7 = vld [vmem:[#allocation7 + $0x48] sm:$0xff]  ;;  %v89_v10 = vld [vmem:[#allocation7 + $0x70] sm:$0xff] }
  0x5e   :  { %178 = vmatprep.mubr.f32.mxu0 %v4002_v0  ;;  %744 = vmatprep.mubr.f32.mxu1 %v4002_v0  ;;  %v3652_v48 = vpack.c.bf16 %v778_v22, %v766_v4  ;;  %v4221_v49 = vand.u32 4294901760, %v4206_v27  ;;  %v3632_v62 = vpack.c.bf16 %v4113_v28, %v4110_v26  ;;  %v3656_v63 = vpack.c.bf16 %v4132_v38, %v4130_v37  ;;  %v4274_v4 = vld [vmem:[#allocation8 + $0x8] sm:$0xff]  ;;  %v1757_v22 = vld [vmem:[#allocation8 + $0x58] sm:$0xff] }
  0x5f   :  { %v224_v53 = vand.u32 4294901760, %v223_v29  ;;  %v218_v54 = vand.u32 4294901760, %v217_v20  ;;  %v783_v55 = vsub.f32 %v4202_v15, %v782_v30  ;;  %v790_v59 = vand.u32 4294901760, %v789_v35 }
  0x60   :  { %3653 = vmatpush1.bf16.msra.mxu1 %v3652_v48  ;;  %v182_v57 = vsub.f32 %v4206_v27, %v4221_v49  ;;  %v3638_v1 = vpack.c.bf16 %v204_v43, %v192_v42  ;;  %v3662_v2 = vpack.c.bf16 %v770_v50, %v758_v47  ;;  %v3640_v17 = vpack.c.bf16 %v210_v46, %v198_v45  ;;  %v4292_v42 = vld [vmem:[#allocation8] sm:$0xff]  ;;  %v1744_v43 = vld [vmem:[#allocation5] sm:$0xff]  ;;  %v4294_v45 = vld [vmem:[#allocation8 + $0x28] sm:$0xff] }
  0x61   :  { %219 = vmatprep.subr.mxu0 %v218_v54  ;;  %v784_v58 = vand.u32 4294901760, %v783_v55  ;;  %v3664_v18 = vpack.c.bf16 %v776_v5, %v764_v51  ;;  %v1230_v19 = vand.u32 4294901760, %v4272_v3  ;;  %v1767_v24 = vand.u32 4294901760, %v4274_v4  ;;  %v1745_v51 = vld [vmem:[#allocation5 + $0x8] sm:$0xff] }
  0x62   :  { %v4230_v60 = vand.u32 4294901760, %v182_v57  ;;  %225 = vmatpush1.msra.mxu0 %v224_v53  ;;  %v1233_v26 = vand.u32 4294901760, %v84_v7  ;;  %v1771_v28 = vand.u32 4294901760, %v1752_v8  ;;  %v1769_v37 = vand.u32 4294901760, %v4292_v42 }
  0x63   :  { %785 = vmatprep.subr.mxu1 %v784_v58  ;;  %3631 = vmatprep.subr.bf16.mxu0 %v3630_v56  ;;  %v1762_v38 = vsel %vm90_vm0, %v1744_v43, 0  ;;  %v4303_v46 = vsub.f32 %v4274_v4, %v1767_v24  ;;  %v1773_v47 = vand.u32 4294901760, %v4294_v45  ;;  %v4307_v50 = vsub.f32 %v4272_v3, %v1230_v19 }
  0x64   :  { %184 = vmatmul.mubr.f32.gmra.mrb[2].mxu0 %v4230_v60  ;;  %750 = vmatmul.mubr.f32.gmra.mrb[2].mxu1 %v4230_v60  ;;  %v4313_v5 = vsub.f32 %v1752_v8, %v1771_v28  ;;  %v4315_v11 = vsub.f32 %v84_v7, %v1233_v26  ;;  %v4319_v29 = vand.u32 4294901760, %v1762_v38  ;;  %v4334_v20 = vand.u32 4294901760, %v89_v10 }
  0x65   :  { %284 = vmatprep.mubr.f32.mxu0 %v4002_v0  ;;  %791 = vmatpush1.msra.mxu1 %v790_v59  ;;  %v4340_v35 = vand.u32 4294901760, %v1757_v22 }
  0x66   :  { %850 = vmatprep.mubr.f32.mxu1 %v4002_v0  ;;  %3655 = vmatprep.subr.bf16.mxu1 %v3654_v61  ;;  %v4347_v48 = vsub.f32 %v1762_v38, %v4319_v29  ;;  %v4370_v58 = vsub.f32 %v89_v10, %v4334_v20 }
  0x67   :  { %v4381_v61 = vsub.f32 %v1757_v22, %v4340_v35 }
  0x68   :  { %286 = vmatmul.mubr.f32.vlgmr.msra.gmra.mrb[0].mxu0 %v4135_v39  ;;  %852 = vmatmul.mubr.f32.vlgmr.msra.gmra.mrb[0].mxu1 %v4135_v39  ;;  %v4407_v3 = vand.u32 4294901760, %v4370_v58 }
  0x69   :  { %3633 = vmatpush1.bf16.msra.mxu0 %v3632_v62  ;;  %291 = vmatprep.mubr.f32.mxu0 %v4002_v0  ;;  %v4386_v62 = vand.u32 4294901760, %v4347_v48  ;;  %v1886_v8 = vand.u32 4294901760, %v4381_v61 }
  0x6a   :  { %857 = vmatprep.mubr.f32.mxu1 %v4002_v0  ;;  %3657 = vmatpush1.bf16.msra.mxu1 %v3656_v63 }
  0x6b   :  { %313 = vmatprep.subr.mxu0 %v4189_v9  ;;  %879 = vmatprep.subr.mxu1 %v4202_v15  ;;  %v4325_v9 = vsub.f32 %v4292_v42, %v1769_v37  ;;  %v4332_v15 = vsub.f32 %v4294_v45, %v1773_v47  ;;  %v1335_v42 = vsub.f32 %v4370_v58, %v4407_v3 }
  0x6c   :  { %293 = vmatmul.mubr.f32.gmra.mrb[2].mxu0 %v4194_v12  ;;  %859 = vmatmul.mubr.f32.gmra.mrb[2].mxu1 %v4194_v12  ;;  %v1887_v45 = vsub.f32 %v4381_v61, %v1886_v8 }
  0x6d   :  { %316 = vmatpush1.msra.mxu0 %v4138_v40  ;;  %375 = vmatprep.mubr.f32.mxu0 %v4002_v0  ;;  %v1320_v40 = vand.u32 4294901760, %v4307_v50  ;;  %v1868_v55 = vand.u32 4294901760, %v4325_v9  ;;  %v1880_v57 = vand.u32 4294901760, %v4332_v15 }
  0x6e   :  { %882 = vmatpush1.msra.mxu1 %v4141_v41  ;;  %941 = vmatprep.mubr.f32.mxu1 %v4002_v0  ;;  %v1327_v41 = vand.u32 4294901760, %v4315_v11  ;;  %v1888_v22 = vand.u32 4294901760, %v1887_v45 }
  0x6f   :  { %3635 = vmatprep.subr.bf16.mxu0 %v4094_v16  ;;  %3659 = vmatprep.subr.bf16.mxu1 %v4104_v23  ;;  %v1321_v56 = vsub.f32 %v4307_v50, %v1320_v40 }
  0x70   :  { %378 = vmatmul.mubr.f32.vlgmr.msra.gmra.mrb[0].mxu0 %v4147_v44  ;;  %944 = vmatmul.mubr.f32.vlgmr.msra.gmra.mrb[0].mxu1 %v4147_v44 }
  0x71   :  { %3637 = vmatpush1.bf16.msra.mxu0 %v4108_v25  ;;  %383 = vmatprep.mubr.f32.mxu0 %v4002_v0  ;;  %v1322_v4 = vand.u32 4294901760, %v1321_v56  ;;  %v3702_v56 = vpack.c.bf16 %v4313_v5, %v4303_v46 }
  0x72   :  { %949 = vmatprep.mubr.f32.mxu1 %v4002_v0  ;;  %3661 = vmatpush1.bf16.msra.mxu1 %v4128_v36 }
  0x73   :  { %401 = vmatprep.subr.mxu0 %v4116_v31  ;;  %967 = vmatprep.subr.mxu1 %v4121_v32 }
  0x74   :  { %386 = vmatmul.mubr.f32.gmra.mrb[2].mxu0 %v4206_v27  ;;  %952 = vmatmul.mubr.f32.gmra.mrb[2].mxu1 %v4206_v27 }
  0x75   :  { %403 = vmatpush1.msra.mxu0 %v4123_v33  ;;  %462 = vmatprep.mubr.f32.mxu0 %v4002_v0 }
  0x76   :  { %969 = vmatpush1.msra.mxu1 %v4125_v34  ;;  %1028 = vmatprep.mubr.f32.mxu1 %v4002_v0 }
  0x77   :  { %3639 = vmatprep.subr.bf16.mxu0 %v3638_v1  ;;  %3663 = vmatprep.subr.bf16.mxu1 %v3662_v2  ;;  %v1869_v2 = vsub.f32 %v4325_v9, %v1868_v55 }
  0x78   :  { %466 = vmatmul.mubr.f32.vlgmr.msra.gmra.mrb[0].mxu0 %v4163_v52  ;;  %1032 = vmatmul.mubr.f32.vlgmr.msra.gmra.mrb[0].mxu1 %v4163_v52 }
  0x79   :  { %3641 = vmatpush1.bf16.msra.mxu0 %v3640_v17  ;;  %471 = vmatprep.mubr.f32.mxu0 %v4002_v0  ;;  %v1841_v17 = vsub.f32 %v4347_v48, %v4386_v62 }
  0x7a   :  { %1037 = vmatprep.mubr.f32.mxu1 %v4002_v0  ;;  %3665 = vmatpush1.bf16.msra.mxu1 %v3664_v18 }
  0x7b   :  { %500 = vmatprep.subr.mxu0 %v216_v14  ;;  %1066 = vmatprep.subr.mxu1 %v782_v30  ;;  %v1765_v14 = vsel %vm90_vm0, %v1745_v51, 0  ;;  %v1756_v30 = vld [vmem:[#allocation8 + $0x50] sm:$0xff]  ;;  %v1336_v51 = vand.u32 4294901760, %v1335_v42 }
  0x7c   :  { %475 = vmatmul.mubr.f32.gmra.mrb[2].mxu0 %v4221_v49  ;;  %1041 = vmatmul.mubr.f32.gmra.mrb[2].mxu1 %v4221_v49  ;;  %v4349_v53 = vand.u32 4294901760, %v1765_v14  ;;  %v4357_v54 = vand.u32 4294901760, %v1756_v30 }
  0x7d   :  { %504 = vmatpush1.msra.mxu0 %v222_v13  ;;  %563 = vmatprep.mubr.f32.mxu0 %v4002_v0  ;;  %v1862_v13 = vand.u32 4294901760, %v4303_v46 }
  0x7e   :  { %1070 = vmatpush1.msra.mxu1 %v788_v21  ;;  %1129 = vmatprep.mubr.f32.mxu1 %v4002_v0  ;;  %v1874_v21 = vand.u32 4294901760, %v4313_v5  ;;  %v4396_v63 = vsub.f32 %v1756_v30, %v4357_v54  ;;  %v3678_v30 = vpack.c.bf16 %v4315_v11, %v4307_v50 }
  0x7f   :  { %3643 = vmatprep.subr.bf16.mxu0 %v4094_v16  ;;  %3667 = vmatprep.subr.bf16.mxu1 %v4104_v23  ;;  %v4353_v16 = vpack.c.bf16 %v1233_v26, %v1230_v19  ;;  %v4355_v23 = vpack.c.bf16 %v1771_v28, %v1767_v24  ;;  %v1870_v19 = vand.u32 4294901760, %v1869_v2 }
  0x80   :  { %565 = vmatmul.mubr.f32.vlgmr.msra.gmra.mrb[0].mxu0 %v4135_v39  ;;  %1131 = vmatmul.mubr.f32.vlgmr.msra.gmra.mrb[0].mxu1 %v4135_v39  ;;  %v1875_v59 = vsub.f32 %v4313_v5, %v1874_v21  ;;  %v1892_v43 = vand.u32 4294901760, %v4396_v63  ;;  %v1750_v5 = vld [vmem:[#allocation8 + $0x20] sm:$0xff] }
  0x81   :  { %3645 = vmatpush1.bf16.msra.mxu0 %v4108_v25  ;;  %570 = vmatprep.mubr.f32.mxu0 %v4002_v0  ;;  %v1863_v25 = vsub.f32 %v4303_v46, %v1862_v13 }
  0x82   :  { %1136 = vmatprep.mubr.f32.mxu1 %v4002_v0  ;;  %3669 = vmatpush1.bf16.msra.mxu1 %v4128_v36  ;;  %v1328_v36 = vsub.f32 %v4315_v11, %v1327_v41  ;;  %v1876_v7 = vand.u32 4294901760, %v1875_v59  ;;  %v1893_v10 = vsub.f32 %v4396_v63, %v1892_v43  ;;  %v4489_v59 = vld [vmem:[#allocation8 + $0x38] sm:$0xff]  ;;  %v1755_v11 = vld [vmem:[#allocation8 + $0x48] sm:$0xff] }
  0x83   :  { %587 = vmatprep.subr.mxu0 %v4116_v31  ;;  %1153 = vmatprep.subr.mxu1 %v4121_v32  ;;  %v4389_v31 = vsub.f32 %v1765_v14, %v4349_v53  ;;  %v4393_v32 = vpack.c.bf16 %v1773_v47, %v1769_v37  ;;  %v1864_v1 = vand.u32 4294901760, %v1863_v25  ;;  %v4433_v37 = vand.u32 4294901760, %v1841_v17  ;;  %v1749_v25 = vld [vmem:[#allocation8 + $0x18] sm:$0xff] }
  0x84   :  { %572 = vmatmul.mubr.f32.gmra.mrb[2].mxu0 %v4194_v12  ;;  %1138 = vmatmul.mubr.f32.gmra.mrb[2].mxu1 %v4194_v12  ;;  %v2333_v46 = vand.u32 4294901760, %v1749_v25 }
  0x85   :  { %589 = vmatpush1.msra.mxu0 %v4123_v33  ;;  %648 = vmatprep.mubr.f32.mxu0 %v4002_v0  ;;  %v1881_v33 = vsub.f32 %v4332_v15, %v1880_v57  ;;  %v4417_v18 = vand.u32 4294901760, %v4389_v31  ;;  %v3698_v28 = vpack.c.bf16 %v1876_v7, %v1864_v1  ;;  %v1758_v1 = vld [vmem:[#allocation8 + $0x60] sm:$0xff] }
  0x86   :  { %1155 = vmatpush1.msra.mxu1 %v4125_v34  ;;  %1214 = vmatprep.mubr.f32.mxu1 %v4002_v0  ;;  %v1329_v34 = vand.u32 4294901760, %v1328_v36  ;;  %v4487_v36 = vld [vmem:[#allocation8 + $0x10] sm:$0xff] }
  0x87   :  { %3671 = vmatprep.subr.bf16.mxu0 %v4353_v16  ;;  %3695 = vmatprep.subr.bf16.mxu1 %v4355_v23  ;;  %v1882_v24 = vand.u32 4294901760, %v1881_v33  ;;  %v1852_v38 = vsub.f32 %v4389_v31, %v4417_v18  ;;  %v1760_v33 = vld [vmem:[#allocation8 + $0x70] sm:$0xff] }
  0x88   :  { %650 = vmatmul.mubr.f32.vlgmr.msra.gmra.mrb[0].mxu0 %v4135_v39  ;;  %1216 = vmatmul.mubr.f32.vlgmr.msra.gmra.mrb[0].mxu1 %v4135_v39  ;;  %v3674_v26 = vpack.c.bf16 %v1329_v34, %v1322_v4 }
  0x89   :  { %3673 = vmatpush3.bf16.msra.mxu0 %v4353_v16  ;;  %655 = vmatprep.mubr.f32.mxu0 %v4002_v0  ;;  %v3700_v47 = vpack.c.bf16 %v1882_v24, %v1870_v19  ;;  %v4446_v14 = vand.u32 4294901760, %v1852_v38 }
  0x8a   :  { %1221 = vmatprep.mubr.f32.mxu1 %v4002_v0  ;;  %3697 = vmatpush1.bf16.msra.mxu1 %v4393_v32 }
  0x8b   :  { %3518 = vmatprep.subr.mxu0 %v4334_v20  ;;  %1776 = vmatprep.subr.mxu1 %v4340_v35 }
  0x8c   :  { %657 = vmatmul.mubr.f32.gmra.mrb[2].mxu0 %v4194_v12  ;;  %1223 = vmatmul.mubr.f32.gmra.mrb[2].mxu1 %v4194_v12 }
  0x8d   :  { %3519 = vmatpush3.msra.mxu0 %v4334_v20  ;;  %3520 = vmatprep.mubr.f32.mxu0 %v4184_v6  ;;  %v1894_v6 = vand.u32 4294901760, %v1893_v10 }
  0x8e   :  { %1778 = vmatpush1.msra.mxu1 %v4357_v54  ;;  %1837 = vmatprep.mubr.f32.mxu1 %v4002_v0 }
  0x8f   :  { %3675 = vmatprep.subr.bf16.mxu0 %v3674_v26  ;;  %3699 = vmatprep.subr.bf16.mxu1 %v3698_v28 }
  0x90   :  { %3521 = vmatmul.mubr.f32.vlgmr.msra.gmra.mrb[4].mxu0 %v4230_v60  ;;  %1843 = vmatmul.mubr.f32.vlgmr.msra.gmra.mrb[4].mxu1 %v4433_v37  ;;  %v3704_v60 = vpack.c.bf16 %v4332_v15, %v4325_v9  ;;  %v2900_v9 = vand.u32 4294901760, %v1750_v5  ;;  %v4504_v15 = vsub.f32 %v1749_v25, %v2333_v46 }
  0x91   :  { %3677 = vmatpush3.bf16.msra.mxu0 %v3674_v26  ;;  %1848 = vmatprep.mubr.f32.mxu1 %v4002_v0 }
  0x92   :  { %3701 = vmatpush1.bf16.msra.mxu1 %v3700_v47  ;;  %3527 = vmatprep.subr.mxu0 %v1336_v51  ;;  %v2428_v34 = vand.u32 4294901760, %v4504_v15 }
  0x93   :  { %1889 = vmatprep.subr.mxu1 %v1888_v22  ;;  %3529 = vmatprep.mubr.f32.mxu0 %v4135_v39 }
  0x94   :  { %1854 = vmatmul.mubr.f32.gmra.mrb[6].mxu1 %v4446_v14 }
  0x95   :  { %3528 = vmatpush3.msra.mxu0 %v1336_v51  ;;  %1954 = vmatprep.mubr.f32.mxu1 %v4002_v0 }
  0x96   :  { %1895 = vmatpush1.msra.mxu1 %v1894_v6  ;;  %3679 = vmatprep.subr.bf16.mxu0 %v3678_v30 }
  0x97   :  { %3703 = vmatprep.subr.bf16.mxu1 %v3702_v56 }
  0x98   :  { %3530 = vmatmul.mubr.f32.vlgmr.msra.gmra.mrb[4].mxu0 %v4194_v12  ;;  %1956 = vmatmul.mubr.f32.vlgmr.msra.gmra.mrb[4].mxu1 %v4319_v29 }
  0x99   :  { %3681 = vmatpush3.bf16.msra.mxu0 %v3678_v30  ;;  %1961 = vmatprep.mubr.f32.mxu1 %v4002_v0 }
  0x9a   :  { %3705 = vmatpush1.bf16.msra.mxu1 %v3704_v60  ;;  %3536 = vmatprep.subr.mxu0 %v4370_v58 }
  0x9b   :  { %1983 = vmatprep.subr.mxu1 %v4381_v61  ;;  %3538 = vmatprep.mubr.f32.mxu0 %v4147_v44  ;;  %v3686_v44 = vpack.c.bf16 %v1327_v41, %v1320_v40  ;;  %v2335_v40 = vand.u32 4294901760, %v4487_v36  ;;  %v2903_v41 = vand.u32 4294901760, %v1755_v11  ;;  %v4522_v61 = vsub.f32 %v1750_v5, %v2900_v9 }
  0x9c   :  { %1963 = vmatmul.mubr.f32.gmra.mrb[6].mxu1 %v4349_v53 }
  0x9d   :  { %3537 = vmatpush3.msra.mxu0 %v4370_v58  ;;  %2045 = vmatprep.mubr.f32.mxu1 %v4002_v0  ;;  %v1754_v58 = vld [vmem:[#allocation8 + $0x40] sm:$0xff]  ;;  %v4524_v4 = vsub.f32 %v1755_v11, %v2903_v41  ;;  %v2990_v24 = vand.u32 4294901760, %v4522_v61 }
  0x9e   :  { %1986 = vmatpush1.msra.mxu1 %v4396_v63  ;;  %3683 = vmatprep.subr.bf16.mxu0 %v4353_v16  ;;  %v2337_v50 = vand.u32 4294901760, %v1754_v58  ;;  %v4538_v63 = vand.u32 4294901760, %v1760_v33 }
  0x9f   :  { %3707 = vmatprep.subr.bf16.mxu1 %v4355_v23  ;;  %v2997_v42 = vand.u32 4294901760, %v4524_v4  ;;  %v2991_v47 = vsub.f32 %v4522_v61, %v2990_v24  ;;  %v3750_v5 = vpack.c.bf16 %v4524_v4, %v4522_v61 }
  0xa0   :  { %3539 = vmatmul.mubr.f32.vlgmr.msra.gmra.mrb[4].mxu0 %v4206_v27  ;;  %2048 = vmatmul.mubr.f32.vlgmr.msra.gmra.mrb[4].mxu1 %v4347_v48  ;;  %v3710_v27 = vpack.c.bf16 %v1874_v21, %v1862_v13  ;;  %v2339_v13 = vand.u32 4294901760, %v4489_v59  ;;  %v4506_v21 = vsub.f32 %v1754_v58, %v2337_v50  ;;  %v4542_v19 = vpack.c.bf16 %v2337_v50, %v2333_v46 }
  0xa1   :  { %3685 = vmatpush3.bf16.msra.mxu0 %v4353_v16  ;;  %2053 = vmatprep.mubr.f32.mxu1 %v4002_v0  ;;  %v4572_v38 = vsub.f32 %v1760_v33, %v4538_v63  ;;  %v2998_v51 = vsub.f32 %v4524_v4, %v2997_v42  ;;  %v2992_v60 = vand.u32 4294901760, %v2991_v47  ;;  %v3758_v11 = vpack.c.bf16 %v2997_v42, %v2990_v24 }
  0xa2   :  { %3709 = vmatpush1.bf16.msra.mxu1 %v4393_v32  ;;  %3545 = vmatprep.subr.mxu0 %v4334_v20  ;;  %v2440_v7 = vand.u32 4294901760, %v4506_v21  ;;  %v3726_v46 = vpack.c.bf16 %v4506_v21, %v4504_v15 }
  0xa3   :  { %2071 = vmatprep.subr.mxu1 %v4340_v35  ;;  %3547 = vmatprep.mubr.f32.mxu0 %v4163_v52  ;;  %v3712_v52 = vpack.c.bf16 %v1880_v57, %v1868_v55  ;;  %v1759_v55 = vld [vmem:[#allocation8 + $0x68] sm:$0xff]  ;;  %v4515_v57 = vsub.f32 %v4489_v59, %v2339_v13  ;;  %v4592_v56 = vand.u32 4294901760, %v4572_v38 }
  0xa4   :  { %2056 = vmatmul.mubr.f32.gmra.mrb[6].mxu1 %v4389_v31  ;;  %v4520_v2 = vand.u32 4294901760, %v1759_v55  ;;  %v2441_v26 = vsub.f32 %v4506_v21, %v2440_v7 }
  0xa5   :  { %3546 = vmatpush3.msra.mxu0 %v4334_v20  ;;  %2132 = vmatprep.mubr.f32.mxu1 %v4002_v0  ;;  %v2446_v17 = vand.u32 4294901760, %v4515_v57  ;;  %v3005_v58 = vsub.f32 %v4572_v38, %v4592_v56 }
  0xa6   :  { %2073 = vmatpush1.msra.mxu1 %v4357_v54  ;;  %3687 = vmatprep.subr.bf16.mxu0 %v3686_v44 }
  0xa7   :  { %3711 = vmatprep.subr.bf16.mxu1 %v3710_v27  ;;  %v2447_v45 = vsub.f32 %v4515_v57, %v2446_v17  ;;  %v3006_v50 = vand.u32 4294901760, %v3005_v58 }
  0xa8   :  { %3548 = vmatmul.mubr.f32.vlgmr.msra.gmra.mrb[4].mxu0 %v4221_v49  ;;  %2136 = vmatmul.mubr.f32.vlgmr.msra.gmra.mrb[4].mxu1 %v4386_v62  ;;  %v4512_v49 = vsub.f32 %v4487_v36, %v2335_v40 }
  0xa9   :  { %3689 = vmatpush3.bf16.msra.mxu0 %v3686_v44  ;;  %2141 = vmatprep.mubr.f32.mxu1 %v4002_v0  ;;  %v2448_v6 = vand.u32 4294901760, %v2447_v45  ;;  %v2999_v44 = vand.u32 4294901760, %v2998_v51 }
  0xaa   :  { %3713 = vmatpush1.bf16.msra.mxu1 %v3712_v52  ;;  %3554 = vmatprep.subr.mxu0 %v4407_v3 }
  0xab   :  { %2170 = vmatprep.subr.mxu1 %v1886_v8  ;;  %3556 = vmatprep.mubr.f32.mxu0 %v4135_v39  ;;  %v2434_v8 = vand.u32 4294901760, %v4512_v49  ;;  %v3746_v59 = vpack.c.bf16 %v2999_v44, %v2992_v60 }
  0xac   :  { %2145 = vmatmul.mubr.f32.gmra.mrb[6].mxu1 %v4417_v18 }
  0xad   :  { %3555 = vmatpush3.msra.mxu0 %v4407_v3  ;;  %2233 = vmatprep.mubr.f32.mxu1 %v4002_v0  ;;  %v4532_v3 = vand.u32 4294901760, %v1758_v1 }
  0xae   :  { %2174 = vmatpush1.msra.mxu1 %v1892_v43  ;;  %3691 = vmatprep.subr.bf16.mxu0 %v4353_v16  ;;  %v4551_v43 = vpack.c.bf16 %v2903_v41, %v2900_v9 }
  0xaf   :  { %3715 = vmatprep.subr.bf16.mxu1 %v4355_v23  ;;  %v4545_v23 = vsub.f32 %v1759_v55, %v4520_v2  ;;  %v4562_v28 = vsub.f32 %v1758_v1, %v4532_v3 }
  0xb0   :  { %3557 = vmatmul.mubr.f32.vlgmr.msra.gmra.mrb[4].mxu0 %v4194_v12  ;;  %2235 = vmatmul.mubr.f32.vlgmr.msra.gmra.mrb[4].mxu1 %v4319_v29 }
  0xb1   :  { %3693 = vmatpush3.bf16.msra.mxu0 %v4353_v16  ;;  %2240 = vmatprep.mubr.f32.mxu1 %v4002_v0  ;;  %v2429_v16 = vsub.f32 %v4504_v15, %v2428_v34  ;;  %v2458_v30 = vand.u32 4294901760, %v4562_v28 }
  0xb2   :  { %3717 = vmatpush1.bf16.msra.mxu1 %v4393_v32  ;;  %3563 = vmatprep.subr.mxu0 %v4334_v20  ;;  %v2435_v32 = vsub.f32 %v4512_v49, %v2434_v8 }
  0xb3   :  { %2257 = vmatprep.subr.mxu1 %v4340_v35  ;;  %3565 = vmatprep.mubr.f32.mxu0 %v4135_v39  ;;  %v4576_v39 = vpack.c.bf16 %v2339_v13, %v2335_v40  ;;  %v2452_v35 = vand.u32 4294901760, %v4545_v23  ;;  %v2430_v10 = vand.u32 4294901760, %v2429_v16  ;;  %v2459_v25 = vsub.f32 %v4562_v28, %v2458_v30 }
  0xb4   :  { %2242 = vmatmul.mubr.f32.gmra.mrb[6].mxu1 %v4349_v53  ;;  %v2436_v22 = vand.u32 4294901760, %v2435_v32 }
  0xb5   :  { %3564 = vmatpush3.msra.mxu0 %v4334_v20  ;;  %2318 = vmatprep.mubr.f32.mxu1 %v4002_v0  ;;  %v2442_v20 = vand.u32 4294901760, %v2441_v26  ;;  %v2460_v52 = vand.u32 4294901760, %v2459_v25 }
  0xb6   :  { %2259 = vmatpush1.msra.mxu1 %v4357_v54  ;;  %3719 = vmatprep.subr.bf16.mxu0 %v4542_v19  ;;  %v2453_v54 = vsub.f32 %v4545_v23, %v2452_v35  ;;  %v3724_v27 = vpack.c.bf16 %v2448_v6, %v2436_v22 }
  0xb7   :  { %3743 = vmatprep.subr.bf16.mxu1 %v4551_v43 }
  0xb8   :  { %3566 = vmatmul.mubr.f32.vlgmr.msra.gmra.mrb[4].mxu0 %v4194_v12  ;;  %2320 = vmatmul.mubr.f32.vlgmr.msra.gmra.mrb[4].mxu1 %v4319_v29  ;;  %v3722_v12 = vpack.c.bf16 %v2442_v20, %v2430_v10  ;;  %v2454_v36 = vand.u32 4294901760, %v2453_v54 }
  0xb9   :  { %3721 = vmatpush1.bf16.msra.mxu0 %v4576_v39  ;;  %2325 = vmatprep.mubr.f32.mxu1 %v4002_v0 }
  0xba   :  { %2342 = vmatprep.subr.mxu0 %v4520_v2  ;;  %3745 = vmatpush3.bf16.msra.mxu1 %v4551_v43 }
  0xbb   :  { %2403 = vmatprep.mubr.f32.mxu0 %v4002_v0  ;;  %3572 = vmatprep.subr.mxu1 %v4538_v63 }
  0xbc   :  { %2327 = vmatmul.mubr.f32.gmra.mrb[6].mxu1 %v4349_v53 }
  0xbd   :  { %2344 = vmatpush1.msra.mxu0 %v4532_v3  ;;  %3574 = vmatprep.mubr.f32.mxu1 %v4433_v37 }
  0xbe   :  { %2409 = vmatmul.mubr.f32.vlgmr.msra.gmra.mrb[6].mxu0 %v4433_v37  ;;  %3723 = vmatprep.subr.bf16.mxu0 %v3722_v12  ;;  %v3728_v37 = vpack.c.bf16 %v4515_v57, %v4512_v49 }
  0xbf   :  { %3725 = vmatpush1.bf16.msra.mxu0 %v3724_v27  ;;  %3573 = vmatpush3.msra.mxu1 %v4538_v63 }
  0xc0   :  { %2414 = vmatprep.mubr.f32.mxu0 %v4002_v0  ;;  %3575 = vmatmul.mubr.f32.vlgmr.msra.gmra.mrb[8].mxu1 %v4446_v14 }
  0xc1   :  { %2455 = vmatprep.subr.mxu0 %v2454_v36  ;;  %3747 = vmatprep.subr.bf16.mxu1 %v3746_v59 }
  0xc2   :  { %2420 = vmatmul.mubr.f32.gmra.mrb[8].mxu0 %v4446_v14  ;;  %3749 = vmatpush3.bf16.msra.mxu1 %v3746_v59  ;;  %v3734_v14 = vpack.c.bf16 %v2440_v7, %v2428_v34 }
  0xc3   :  { %2461 = vmatpush1.msra.mxu0 %v2460_v52  ;;  %2520 = vmatprep.mubr.f32.mxu0 %v4002_v0 }
  0xc4   :  { %3727 = vmatprep.subr.bf16.mxu0 %v3726_v46  ;;  %3581 = vmatprep.subr.mxu1 %v3006_v50 }
  0xc5   :  { %3583 = vmatprep.mubr.f32.mxu1 %v4319_v29 }
  0xc6   :  { %2522 = vmatmul.mubr.f32.vlgmr.msra.gmra.mrb[6].mxu0 %v4319_v29  ;;  %3582 = vmatpush3.msra.mxu1 %v3006_v50 }
  0xc7   :  { %3729 = vmatpush1.bf16.msra.mxu0 %v3728_v37  ;;  %2527 = vmatprep.mubr.f32.mxu0 %v4002_v0 }
  0xc8   :  { %3584 = vmatmul.mubr.f32.vlgmr.msra.gmra.mrb[8].mxu1 %v4349_v53  ;;  %2549 = vmatprep.subr.mxu0 %v4545_v23 }
  0xc9   :  { %3751 = vmatprep.subr.bf16.mxu1 %v3750_v5  ;;  %3592 = vmatprep.mubr.f32.mxu1 %v4347_v48 }
  0xca   :  { %2529 = vmatmul.mubr.f32.gmra.mrb[8].mxu0 %v4349_v53  ;;  %3753 = vmatpush3.bf16.msra.mxu1 %v3750_v5 }
  0xcb   :  { %2552 = vmatpush1.msra.mxu0 %v4562_v28  ;;  %2611 = vmatprep.mubr.f32.mxu0 %v4002_v0 }
  0xcc   :  { %3731 = vmatprep.subr.bf16.mxu0 %v4542_v19  ;;  %3590 = vmatprep.subr.mxu1 %v4572_v38 }
  0xce   :  { %2614 = vmatmul.mubr.f32.vlgmr.msra.gmra.mrb[6].mxu0 %v4347_v48  ;;  %3591 = vmatpush3.msra.mxu1 %v4572_v38  ;;  %v3736_v48 = vpack.c.bf16 %v2446_v17, %v2434_v8 }
  0xcf   :  { %3733 = vmatpush1.bf16.msra.mxu0 %v4576_v39  ;;  %2619 = vmatprep.mubr.f32.mxu0 %v4002_v0 }
  0xd0   :  { %3593 = vmatmul.mubr.f32.vlgmr.msra.gmra.mrb[8].mxu1 %v4389_v31  ;;  %2637 = vmatprep.subr.mxu0 %v4520_v2 }
  0xd1   :  { %3755 = vmatprep.subr.bf16.mxu1 %v4551_v43  ;;  %3601 = vmatprep.mubr.f32.mxu1 %v4386_v62 }
  0xd2   :  { %2622 = vmatmul.mubr.f32.gmra.mrb[8].mxu0 %v4389_v31  ;;  %3757 = vmatpush3.bf16.msra.mxu1 %v4551_v43 }
  0xd3   :  { %2639 = vmatpush1.msra.mxu0 %v4532_v3  ;;  %2698 = vmatprep.mubr.f32.mxu0 %v4002_v0 }
  0xd4   :  { %3735 = vmatprep.subr.bf16.mxu0 %v3734_v14  ;;  %3599 = vmatprep.subr.mxu1 %v4538_v63 }
  0xd6   :  { %2702 = vmatmul.mubr.f32.vlgmr.msra.gmra.mrb[6].mxu0 %v4386_v62  ;;  %3600 = vmatpush3.msra.mxu1 %v4538_v63 }
  0xd7   :  { %3737 = vmatpush1.bf16.msra.mxu0 %v3736_v48  ;;  %2707 = vmatprep.mubr.f32.mxu0 %v4002_v0 }
  0xd8   :  { %3602 = vmatmul.mubr.f32.vlgmr.msra.gmra.mrb[8].mxu1 %v4417_v18  ;;  %2736 = vmatprep.subr.mxu0 %v2452_v35 }
  0xd9   :  { %3759 = vmatprep.subr.bf16.mxu1 %v3758_v11  ;;  %3610 = vmatprep.mubr.f32.mxu1 %v4319_v29 }
  0xda   :  { %2711 = vmatmul.mubr.f32.gmra.mrb[8].mxu0 %v4417_v18  ;;  %3761 = vmatpush3.bf16.msra.mxu1 %v3758_v11 }
  0xdb   :  { %2740 = vmatpush1.msra.mxu0 %v2458_v30  ;;  %2799 = vmatprep.mubr.f32.mxu0 %v4002_v0 }
  0xdc   :  { %3739 = vmatprep.subr.bf16.mxu0 %v4542_v19  ;;  %3608 = vmatprep.subr.mxu1 %v4592_v56 }
  0xde   :  { %2801 = vmatmul.mubr.f32.vlgmr.msra.gmra.mrb[6].mxu0 %v4319_v29  ;;  %3609 = vmatpush3.msra.mxu1 %v4592_v56 }
  0xdf   :  { %3741 = vmatpush1.bf16.msra.mxu0 %v4576_v39  ;;  %2806 = vmatprep.mubr.f32.mxu0 %v4002_v0 }
  0xe0   :  { %3611 = vmatmul.mubr.f32.vlgmr.msra.gmra.mrb[8].mxu1 %v4349_v53  ;;  %2823 = vmatprep.subr.mxu0 %v4520_v2 }
  0xe1   :  { %3763 = vmatprep.subr.bf16.mxu1 %v4551_v43  ;;  %3619 = vmatprep.mubr.f32.mxu1 %v4319_v29 }
  0xe2   :  { %2808 = vmatmul.mubr.f32.gmra.mrb[8].mxu0 %v4349_v53  ;;  %3765 = vmatpush3.bf16.msra.mxu1 %v4551_v43 }
  0xe3   :  { %2825 = vmatpush1.msra.mxu0 %v4532_v3  ;;  %2884 = vmatprep.mubr.f32.mxu0 %v4002_v0 }
  0xe4   :  { %3617 = vmatprep.subr.mxu1 %v4538_v63 }
  0xe6   :  { %2886 = vmatmul.mubr.f32.vlgmr.msra.gmra.mrb[6].mxu0 %v4319_v29  ;;  %3618 = vmatpush3.msra.mxu1 %v4538_v63 }
  0xe7   :  { %2891 = vmatprep.mubr.f32.mxu0 %v4002_v0 }
  0xe8   :  { %3620 = vmatmul.mubr.f32.vlgmr.msra.gmra.mrb[8].mxu1 %v4349_v53 }
  0xea   :  { %2893 = vmatmul.mubr.f32.gmra.mrb[8].mxu0 %v4349_v53 }
 0x15b   :  { %v651_v62 = vpop.f32.mrb[0].mxu0  ;;  %v1217_v31 = vpop.f32.mrb[0].mxu1 }
 0x15c   :  { %3414 = vst [vmem:[#allocation10] sm:$0xff] %v651_v62  ;;  %3416 = vst [vmem:[#allocation10 + $0x10] sm:$0xff] %v1217_v31  ;;  %v653_v18 = vpop.f32.mrb[1].mxu0  ;;  %v1219_v40 = vpop.f32.mrb[1].mxu1 }
 0x15d   :  { %3415 = vst [vmem:[#allocation10 + $0x8] sm:$0xff] %v653_v18  ;;  %3417 = vst [vmem:[#allocation10 + $0x18] sm:$0xff] %v1219_v40 }
 0x15f   :  { %v658_v13 = vpop.f32.mrb[2].mxu0  ;;  %v1224_v9 = vpop.f32.mrb[2].mxu1 }
 0x160   :  { %3420 = vst [vmem:[#allocation10 + $0x28] sm:$0xff] %v658_v13  ;;  %3422 = vst [vmem:[#allocation10 + $0x38] sm:$0xff] %v1224_v9  ;;  %v660_v29 = vpop.f32.mrb[3].mxu0  ;;  %v1226_v41 = vpop.f32.mrb[3].mxu1 }
 0x161   :  { %3421 = vst [vmem:[#allocation10 + $0x30] sm:$0xff] %v660_v29  ;;  %3423 = vst [vmem:[#allocation10 + $0x40] sm:$0xff] %v1226_v41 }
 0x18b   :  { %v3567_v0 = vpop.f32.mrb[4].mxu0  ;;  %v2321_v15 = vpop.f32.mrb[4].mxu1 }
 0x18c   :  { %3424 = vst.msk [vmem:[#allocation10 + $0x48] sm:$0xff] %vm3418_vm1, %v3567_v0  ;;  %3425 = vst [vmem:[#allocation10 + $0x50] sm:$0xff] %v2321_v15  ;;  %v1734_v53 = vpop.f32.mrb[5].mxu0  ;;  %v2323_v21 = vpop.f32.mrb[5].mxu1 }
 0x18d   :  { %3419 = vst.msk [vmem:[#allocation10 + $0x20] sm:$0xff] %vm3418_vm1, %v1734_v53  ;;  %3426 = vst [vmem:[#allocation10 + $0x58] sm:$0xff] %v2323_v21 }
 0x18f   :  { %v2328_v55 = vpop.f32.mrb[6].mxu1 }
 0x190   :  { %3430 = vst [vmem:[#allocation10 + $0x78] sm:$0xff] %v2328_v55  ;;  %v2330_v49 = vpop.f32.mrb[7].mxu1 }
 0x191   :  { %3431 = vst [vmem:[#allocation10 + $0x80] sm:$0xff] %v2330_v49 }
 0x1b9   :  { %v2887_v57 = vpop.f32.mrb[6].mxu0 }
 0x1ba   :  { %3427 = vst [vmem:[#allocation10 + $0x60] sm:$0xff] %v2887_v57  ;;  %v2889_v1 = vpop.f32.mrb[7].mxu0 }
 0x1bb   :  { %3428 = vst [vmem:[#allocation10 + $0x68] sm:$0xff] %v2889_v1  ;;  %v3621_v2 = vpop.f32.mrb[8].mxu1 }
 0x1bc   :  { %3434 = vst.msk [vmem:[#allocation10 + $0x98] sm:$0xff] %vm3418_vm1, %v3621_v2  ;;  %v3404_v33 = vpop.f32.mrb[9].mxu1 }
 0x1bd   :  { %v2894_v61 = vpop.f32.mrb[8].mxu0  ;;  %3429 = vst.msk [vmem:[#allocation10 + $0x70] sm:$0xff] %vm3418_vm1, %v3404_v33 }
 0x1be   :  { %3432 = vst [vmem:[#allocation10 + $0x88] sm:$0xff] %v2894_v61  ;;  %v2896_v4 = vpop.f32.mrb[9].mxu0 }
 0x1bf   :  { %3433 = vst [vmem:[#allocation10 + $0x90] sm:$0xff] %v2896_v4 }
 0x1c0   :  { %3975 = shalt.err (!%p3972_p8)
}
 0x1c1   :  { %s3976_s15 = scalar_lea.hbm %s4713_s4, 2560 }
 0x1c2   :  { %p3977_p9 = scmp.ne.s32.totalorder %s4713_s4, %s3976_s15  ;;  %p3980_p10 = scmp.lt.u32.totalorder %s3976_s15, %s4713_s4 }
 0x1c4   :  { %p3982_p11 = pnand %p3980_p10, %p3977_p9 }
 0x1c6   :  { %3985 = shalt.err (!%p3982_p11)
}
 0x1c7   :  { %3446 = dma.vmem_to_hbm [thread:$0]  %s3441_s12, 2560, %s4713_s4, [#allocation4], %s3999_s0, %s3999_s0, %s4000_s18  }
 0x1c8   :  { %3992 = dma.done.wait [#allocation4], 2560  }
 0x1c9   :  { %3993 = vsyncadd [#allocation4], 4294964736 }
 0x1ca   :  { %3450 = vsyncpa [#allocation3], 1 }
 0x1cb   :  { %3451 = vsyncpa [#allocation6], 1 }
 0x1cc   :  { %3452 = vsyncpa [#allocation9], 1 }
 0x1cd   :  { %3453 = vsyncpa [#allocation4], 1 }

</bundles_post_ra>
